<compile_context>
chip_gen: v6e
topology: v6e:2x2x1
jax: 0.10.0
libtpu: 0.0.40
codegen_flags: <defaults>
</compile_context>

<pallas_src>
import functools

import jax
import jax.numpy as jnp
from jax.experimental import pallas as pl
from jax.experimental.pallas import tpu as pltpu


def _mlp_decoder_kernel(
    x_ref, w1_ref, b1_ref, w2_ref, b2_ref, w3_ref, b3_ref, o_ref, *, hidden_dim
):
    """One batch tile: two (Linear + GLU) layers + output projection, fully fused."""
    # In-kernel cast: x arrives as the caller's dtype (f32), MXU inputs are bf16.
    x = x_ref[...].astype(jnp.bfloat16)  # (TB, latent_dim)

    # --- layer 1: Linear(latent_dim, 2*hidden) + GLU(dim=1) ---
    y = jnp.dot(x, w1_ref[...], preferred_element_type=jnp.float32) + b1_ref[...]
    # hidden_dim is a multiple of 128 -> lane-aligned slice, free vreg selection.
    h = (y[:, :hidden_dim] * jax.nn.sigmoid(y[:, hidden_dim:])).astype(jnp.bfloat16)
    # Dropout(p=0.0) is the identity in forward -> nothing to do.

    # --- layer 2: Linear(hidden, 2*hidden) + GLU(dim=1) ---
    y = jnp.dot(h, w2_ref[...], preferred_element_type=jnp.float32) + b2_ref[...]
    h = (y[:, :hidden_dim] * jax.nn.sigmoid(y[:, hidden_dim:])).astype(jnp.bfloat16)

    # --- output projection: Linear(hidden, input_dim) ---
    o_ref[...] = (
        jnp.dot(h, w3_ref[...], preferred_element_type=jnp.float32) + b3_ref[...]
    ).astype(o_ref.dtype)


def _round_up(n, m):
    return ((n + m - 1) // m) * m


@functools.partial(jax.jit, static_argnames=("batch_tile", "out_dtype"))
def mlp_decoder_forward(x, params, *, batch_tile=512, out_dtype=jnp.float32):
    """x: (batch, latent_dim) f32.  params: combined bf16 weights, f32 biases.

    out_dtype=jnp.bfloat16 halves writeback bytes if the consumer tolerates it
    (biggest win on v5e's 820 GB/s HBM); default f32 matches the PyTorch module.
    """
    batch, latent_dim = x.shape
    two_hidden = params["w1"].shape[1]
    hidden_dim = two_hidden // 2
    input_dim = params["w3"].shape[1]

    MIN_TILE = 16  # bf16 sublane packing
    # Batch tile: multiple of 16, as large as the budget allows.
    tb = max(MIN_TILE, min(batch_tile, _round_up(batch, MIN_TILE)))
    # v7x megacore: make sure the "parallel" grid axis has >= 2 steps when the
    # batch allows it, so both TensorCores get work.
    if _round_up(batch, MIN_TILE) >= 2 * MIN_TILE and pl.cdiv(batch, tb) < 2:
        tb = _round_up(pl.cdiv(batch, 2), MIN_TILE)

    padded = pl.cdiv(batch, tb) * tb
    x_in = x
    if padded != batch:
        # Zero rows are safe through the whole network; results are dropped below.
        x_in = jnp.pad(x_in, ((0, padded - batch), (0, 0)))

    grid = (padded // tb,)

    # x / out: tiled along batch. Weights/biases: constant block index (never
    # re-DMA'd) and single-buffered so they don't pay the 2x pipeline buffer tax.
    x_spec = pl.BlockSpec((tb, latent_dim), lambda i: (i, 0))
    out_spec = pl.BlockSpec((tb, input_dim), lambda i: (i, 0))

    def wspec(shape):
        return pl.BlockSpec(shape, lambda i: (0, 0), pipeline_mode=pl.Buffered(1))

    in_specs = [
        x_spec,
        wspec((latent_dim, two_hidden)), wspec((1, two_hidden)),
        wspec((hidden_dim, two_hidden)), wspec((1, two_hidden)),
        wspec((hidden_dim, input_dim)), wspec((1, input_dim)),
    ]

    # Explicit VMEM budget: resident weights (single-buffered) + double-buffered
    # x/out tiles + f32 pre-activation / epilogue scratch + headroom.
    def _nbytes(a):
        return a.size * a.dtype.itemsize

    weight_bytes = sum(_nbytes(params[k]) for k in ("w1", "b1", "w2", "b2", "w3", "b3"))
    io_bytes = 2 * (tb * latent_dim * x.dtype.itemsize
                    + tb * input_dim * jnp.dtype(out_dtype).itemsize)
    scratch_bytes = 2 * tb * two_hidden * 4  # f32 GLU pre-activations + working set
    vmem_limit = min(int(weight_bytes + io_bytes + scratch_bytes) + (16 << 20), 100 << 20)

    kernel = functools.partial(_mlp_decoder_kernel, hidden_dim=hidden_dim)

    out = pl.pallas_call(
        kernel,
        out_shape=jax.ShapeDtypeStruct((padded, input_dim), out_dtype),
        grid=grid,
        in_specs=in_specs,
        out_specs=out_spec,
        compiler_params=pltpu.CompilerParams(
            dimension_semantics=("parallel",),  # v7x: shard batch across 2 TCs
            vmem_limit_bytes=vmem_limit,
        ),
    )(
        x_in,
        params["w1"], params["b1"],
        params["w2"], params["b2"],
        params["w3"], params["b3"],
    )
    return out[:batch]


def init_params(key, latent_dim, hidden_dim, input_dim):
    """Deterministic init mimicking nn.Linear's U(-1/sqrt(fan_in), 1/sqrt(fan_in)).

    Weights are stored transposed to (in_features, out_features) and cast to
    bf16 for the MXU; biases stay f32. GLU weights stay combined (in, 2*hidden)
    so each layer is a single lane-dense matmul."""
    keys = jax.random.split(key, 6)

    def linear(kw, kb, fan_in, fan_out):
        bound = 1.0 / jnp.sqrt(fan_in)
        w = jax.random.uniform(kw, (fan_in, fan_out), jnp.float32, -bound, bound)
        b = jax.random.uniform(kb, (1, fan_out), jnp.float32, -bound, bound)
        return w.astype(jnp.bfloat16), b

    w1, b1 = linear(keys[0], keys[1], latent_dim, 2 * hidden_dim)
    w2, b2 = linear(keys[2], keys[3], hidden_dim, 2 * hidden_dim)
    w3, b3 = linear(keys[4], keys[5], hidden_dim, input_dim)
    return dict(w1=w1, b1=b1, w2=w2, b2=b2, w3=w3, b3=b3)


def reference_forward(x, p):
    """Pure-JAX reference of the PyTorch forward, using the same bf16-matmul /
    f32-accumulate precision scheme as the kernel for a tight comparison."""
    hidden_dim = p["w1"].shape[1] // 2

    def glu_layer(h, w, b):
        y = jnp.dot(h.astype(jnp.bfloat16), w, preferred_element_type=jnp.float32) + b
        return (y[:, :hidden_dim] * jax.nn.sigmoid(y[:, hidden_dim:])).astype(jnp.bfloat16)

    h = glu_layer(x, p["w1"], p["b1"])
    h = glu_layer(h, p["w2"], p["b2"])
    return jnp.dot(h, p["w3"], preferred_element_type=jnp.float32) + p["b3"]


if __name__ == "__main__":
    # Small shapes consistent with the module's forward: x is (batch, latent_dim).
    # hidden_dim / input_dim are multiples of 128 so every matmul and the GLU
    # slice are lane-dense.
    batch, latent_dim, hidden_dim, input_dim = 16, 32, 128, 128

    key = jax.random.PRNGKey(0)
    k_x, k_p = jax.random.split(key)
    x = jax.random.normal(k_x, (batch, latent_dim), jnp.float32)
    params = init_params(k_p, latent_dim, hidden_dim, input_dim)

    out = mlp_decoder_forward(x, params)
    out = jax.block_until_ready(out)

    ref = reference_forward(x, params)
    assert out.shape == (batch, input_dim)
    assert jnp.allclose(out, ref, atol=1e-2, rtol=1e-2), "mismatch vs JAX reference"

    print("KERNEL_OK")
</pallas_src>

<mosaic_0001>
module attributes {stable_mosaic.version = 11 : i64} {
  func.func @_mlp_decoder_kernel(%arg0: i32, %arg1: memref<16x32xf32, #tpu.memory_space<vmem>>, %arg2: memref<32x256xbf16, #tpu.memory_space<vmem>>, %arg3: memref<1x256xf32, #tpu.memory_space<vmem>>, %arg4: memref<128x256xbf16, #tpu.memory_space<vmem>>, %arg5: memref<1x256xf32, #tpu.memory_space<vmem>>, %arg6: memref<128x128xbf16, #tpu.memory_space<vmem>>, %arg7: memref<1x128xf32, #tpu.memory_space<vmem>>, %arg8: memref<16x128xf32, #tpu.memory_space<vmem>>) attributes {dimension_semantics = [#tpu.dimension_semantics<parallel>], iteration_bounds = array<i64: 1>, scalar_prefetch = 0 : i64, scratch_operands = 0 : i64, tpu.core_type = #tpu.core_type<tc>, window_params = [{transform_indices = @transform_0, window_bounds = array<i64: 16, 32>}, {pipeline_mode = #tpu.pipeline_mode<synchronous>, transform_indices = @transform_1, window_bounds = array<i64: 32, 256>}, {pipeline_mode = #tpu.pipeline_mode<synchronous>, transform_indices = @transform_2, window_bounds = array<i64: 1, 256>}, {pipeline_mode = #tpu.pipeline_mode<synchronous>, transform_indices = @transform_3, window_bounds = array<i64: 128, 256>}, {pipeline_mode = #tpu.pipeline_mode<synchronous>, transform_indices = @transform_4, window_bounds = array<i64: 1, 256>}, {pipeline_mode = #tpu.pipeline_mode<synchronous>, transform_indices = @transform_5, window_bounds = array<i64: 128, 128>}, {pipeline_mode = #tpu.pipeline_mode<synchronous>, transform_indices = @transform_6, window_bounds = array<i64: 1, 128>}, {transform_indices = @transform_7, window_bounds = array<i64: 16, 128>}]} {
    %c0 = arith.constant 0 : index
    %c0_0 = arith.constant 0 : index
    %0 = vector.load %arg1[%c0, %c0_0] : memref<16x32xf32, #tpu.memory_space<vmem>>, vector<16x32xf32>
    %1 = arith.truncf %0 : vector<16x32xf32> to vector<16x32xbf16>
    %c0_1 = arith.constant 0 : index
    %c0_2 = arith.constant 0 : index
    %2 = vector.load %arg2[%c0_1, %c0_2] : memref<32x256xbf16, #tpu.memory_space<vmem>>, vector<32x256xbf16>
    %cst = arith.constant dense<0.000000e+00> : vector<16x256xf32>
    %3 = tpu.matmul %1, %2, %cst {dimension_numbers = #tpu.dot_dimension_numbers<[1], [0], [0], [1], [0, 0, 1, 1], [], []>} : vector<16x32xbf16>, vector<32x256xbf16>, vector<16x256xf32> -> vector<16x256xf32>
    %c0_3 = arith.constant 0 : index
    %c0_4 = arith.constant 0 : index
    %4 = vector.load %arg3[%c0_3, %c0_4] : memref<1x256xf32, #tpu.memory_space<vmem>>, vector<1x256xf32>
    %5 = vector.broadcast %4 : vector<1x256xf32> to vector<16x256xf32>
    %6 = arith.addf %3, %5 : vector<16x256xf32>
    %7 = vector.extract_strided_slice %6 {offsets = [0, 0], sizes = [16, 128], strides = [1, 1]} : vector<16x256xf32> to vector<16x128xf32>
    %8 = vector.extract_strided_slice %6 {offsets = [0, 128], sizes = [16, 128], strides = [1, 1]} : vector<16x256xf32> to vector<16x128xf32>
    %9 = arith.negf %8 : vector<16x128xf32>
    %10 = math.exp %9 : vector<16x128xf32>
    %cst_5 = arith.constant 1.000000e+00 : f32
    %11 = vector.broadcast %cst_5 : f32 to vector<16x128xf32>
    %12 = arith.addf %11, %10 : vector<16x128xf32>
    %13 = arith.divf %11, %12 : vector<16x128xf32>
    %14 = arith.mulf %7, %13 : vector<16x128xf32>
    %15 = arith.truncf %14 : vector<16x128xf32> to vector<16x128xbf16>
    %c0_6 = arith.constant 0 : index
    %c0_7 = arith.constant 0 : index
    %16 = vector.load %arg4[%c0_6, %c0_7] : memref<128x256xbf16, #tpu.memory_space<vmem>>, vector<128x256xbf16>
    %cst_8 = arith.constant dense<0.000000e+00> : vector<16x256xf32>
    %17 = tpu.matmul %15, %16, %cst_8 {dimension_numbers = #tpu.dot_dimension_numbers<[1], [0], [0], [1], [0, 0, 1, 1], [], []>} : vector<16x128xbf16>, vector<128x256xbf16>, vector<16x256xf32> -> vector<16x256xf32>
    %c0_9 = arith.constant 0 : index
    %c0_10 = arith.constant 0 : index
    %18 = vector.load %arg5[%c0_9, %c0_10] : memref<1x256xf32, #tpu.memory_space<vmem>>, vector<1x256xf32>
    %19 = vector.broadcast %18 : vector<1x256xf32> to vector<16x256xf32>
    %20 = arith.addf %17, %19 : vector<16x256xf32>
    %21 = vector.extract_strided_slice %20 {offsets = [0, 0], sizes = [16, 128], strides = [1, 1]} : vector<16x256xf32> to vector<16x128xf32>
    %22 = vector.extract_strided_slice %20 {offsets = [0, 128], sizes = [16, 128], strides = [1, 1]} : vector<16x256xf32> to vector<16x128xf32>
    %23 = arith.negf %22 : vector<16x128xf32>
    %24 = math.exp %23 : vector<16x128xf32>
    %cst_11 = arith.constant 1.000000e+00 : f32
    %25 = vector.broadcast %cst_11 : f32 to vector<16x128xf32>
    %26 = arith.addf %25, %24 : vector<16x128xf32>
    %27 = arith.divf %25, %26 : vector<16x128xf32>
    %28 = arith.mulf %21, %27 : vector<16x128xf32>
    %29 = arith.truncf %28 : vector<16x128xf32> to vector<16x128xbf16>
    %c0_12 = arith.constant 0 : index
    %c0_13 = arith.constant 0 : index
    %30 = vector.load %arg6[%c0_12, %c0_13] : memref<128x128xbf16, #tpu.memory_space<vmem>>, vector<128x128xbf16>
    %cst_14 = arith.constant dense<0.000000e+00> : vector<16x128xf32>
    %31 = tpu.matmul %29, %30, %cst_14 {dimension_numbers = #tpu.dot_dimension_numbers<[1], [0], [0], [1], [0, 0, 1, 1], [], []>} : vector<16x128xbf16>, vector<128x128xbf16>, vector<16x128xf32> -> vector<16x128xf32>
    %c0_15 = arith.constant 0 : index
    %c0_16 = arith.constant 0 : index
    %32 = vector.load %arg7[%c0_15, %c0_16] : memref<1x128xf32, #tpu.memory_space<vmem>>, vector<1x128xf32>
    %33 = vector.broadcast %32 : vector<1x128xf32> to vector<16x128xf32>
    %34 = arith.addf %31, %33 : vector<16x128xf32>
    %c0_17 = arith.constant 0 : index
    %c0_18 = arith.constant 0 : index
    %35 = vector.load %arg8[%c0_17, %c0_18] : memref<16x128xf32, #tpu.memory_space<vmem>>, vector<16x128xf32>
    tpu.vector_store %arg8[%c0_17, %c0_18], %34 {strides = array<i32>} : memref<16x128xf32, #tpu.memory_space<vmem>>, vector<16x128xf32>,
    return
  }
  func.func @transform_0(%arg0: i32) -> (i32, i32) {
    %c0_i32 = arith.constant 0 : i32
    %c0_i32_0 = arith.constant 0 : i32
    return %arg0, %c0_i32 : i32, i32
  }
  func.func @transform_1(%arg0: i32) -> (i32, i32) {
    %c0_i32 = arith.constant 0 : i32
    %c0_i32_0 = arith.constant 0 : i32
    %c0_i32_1 = arith.constant 0 : i32
    return %c0_i32, %c0_i32_0 : i32, i32
  }
  func.func @transform_2(%arg0: i32) -> (i32, i32) {
    %c0_i32 = arith.constant 0 : i32
    %c0_i32_0 = arith.constant 0 : i32
    %c0_i32_1 = arith.constant 0 : i32
    return %c0_i32, %c0_i32_0 : i32, i32
  }
  func.func @transform_3(%arg0: i32) -> (i32, i32) {
    %c0_i32 = arith.constant 0 : i32
    %c0_i32_0 = arith.constant 0 : i32
    %c0_i32_1 = arith.constant 0 : i32
    return %c0_i32, %c0_i32_0 : i32, i32
  }
  func.func @transform_4(%arg0: i32) -> (i32, i32) {
    %c0_i32 = arith.constant 0 : i32
    %c0_i32_0 = arith.constant 0 : i32
    %c0_i32_1 = arith.constant 0 : i32
    return %c0_i32, %c0_i32_0 : i32, i32
  }
  func.func @transform_5(%arg0: i32) -> (i32, i32) {
    %c0_i32 = arith.constant 0 : i32
    %c0_i32_0 = arith.constant 0 : i32
    %c0_i32_1 = arith.constant 0 : i32
    return %c0_i32, %c0_i32_0 : i32, i32
  }
  func.func @transform_6(%arg0: i32) -> (i32, i32) {
    %c0_i32 = arith.constant 0 : i32
    %c0_i32_0 = arith.constant 0 : i32
    %c0_i32_1 = arith.constant 0 : i32
    return %c0_i32, %c0_i32_0 : i32, i32
  }
  func.func @transform_7(%arg0: i32) -> (i32, i32) {
    %c0_i32 = arith.constant 0 : i32
    %c0_i32_0 = arith.constant 0 : i32
    return %arg0, %c0_i32 : i32, i32
  }
}

</mosaic_0001>

<bundles_post_ra>
// kernel: mlp_decoder_forward.1
= control target key start
LH: loop header
LB: loop body
LE: loop exit
PB: predicated region body
PF: predicated region fallthrough
CT: control target
= control target key end

     0   :  { %12 = vsyncpa [#allocation3], 0  ;;  %s845_s0 = inlined_call_operand.hbm [shape: f32[16,32], index: 0, kind: input, shape index: {}]   ;;  %s846_s1 = inlined_call_operand.hbm [shape: bf16[32,256], index: 1, kind: input, shape index: {}]   ;;  %s847_s2 = inlined_call_operand.hbm [shape: f32[1,256], index: 2, kind: input, shape index: {}]   ;;  %s848_s3 = inlined_call_operand.hbm [shape: bf16[128,256], index: 3, kind: input, shape index: {}]   ;;  %s849_s4 = inlined_call_operand.vmem [shape: f32[1,256], index: 4, kind: input, shape index: {}]   ;;  %s850_s5 = inlined_call_operand.hbm [shape: bf16[128,128], index: 5, kind: input, shape index: {}]   ;;  %s851_s6 = inlined_call_operand.vmem [shape: f32[1,128], index: 6, kind: input, shape index: {}]   ;;  %s852_s7 = inlined_call_operand.hbm [shape: f32[16,128], index: 7, kind: output, shape index: {}]  }
   0x1   :  { %13 = vsyncpa [#allocation6], 0 }
   0x2   :  { %14 = vsyncpa [#allocation9], 0 }
   0x3   :  { %15 = vsyncpa [#allocation4], 0  ;;  %s752_s24 = smov [#allocation5]   ;;  %s753_s26 = smov [#allocation8]  }
   0x4   :  { %s33_s25 = sshll.u32 %s752_s24, 4  ;;  %s55_s27 = sshll.u32 %s753_s26, 4  ;;  %s34_s25 = int_to_ptr.vmem [resolvable:$true] %s33_s25  ;;  %s56_s27 = int_to_ptr.vmem [resolvable:$true] %s55_s27 }
   0x5   :  { %s632_s28 = scalar_lea.vmem %s34_s25, 512  ;;  %p637_p1 = scmp.lt.s32.totalorder %s34_s25, %s34_s25 }
   0x6   :  { %p633_p0 = scmp.ne.s32.totalorder %s34_s25, %s632_s28  ;;  %p638_p2 = scmp.lt.s32.totalorder %s632_s28, %s632_s28 }
   0x8   :  { %p639_p3 = por %p638_p2, %p637_p1 }
   0xa   :  { %p640_p4 = pnand %p639_p3, %p633_p0 }
   0xc   :  { %643 = shalt.err (!%p640_p4)
}
   0xd   :  { %s754_s29 = smov 128   ;;  %s755_s30 = smov 8  }
   0xe   :  { %39 = dma.hbm_to_vmem [thread:$0]  %s846_s1, 512, %s34_s25, [#allocation6], %s754_s29, %s754_s29, %s755_s30  }
   0xf   :  { %s652_s10 = scalar_lea.vmem %s56_s27, 2048  ;;  %p657_p6 = scmp.lt.s32.totalorder %s56_s27, %s56_s27 }
  0x10   :  { %p653_p5 = scmp.ne.s32.totalorder %s56_s27, %s652_s10  ;;  %p658_p7 = scmp.lt.s32.totalorder %s652_s10, %s652_s10 }
  0x12   :  { %p659_p8 = por %p658_p7, %p657_p6 }
  0x14   :  { %p660_p9 = pnand %p659_p8, %p653_p5 }
  0x16   :  { %663 = shalt.err (!%p660_p9)
}
  0x17   :  { %61 = dma.hbm_to_vmem [thread:$0]  %s848_s3, 2048, %s56_s27, [#allocation9], %s754_s29, %s754_s29, %s755_s30  }
  0x18   :  { %s756_s13 = smov [#allocation2]   ;;  %s757_s15 = smov [#allocation7]  }
  0x19   :  { %s21_s14 = sshll.u32 %s756_s13, 4  ;;  %s46_s16 = sshll.u32 %s757_s15, 4  ;;  %s22_s14 = int_to_ptr.vmem [resolvable:$true] %s21_s14  ;;  %s47_s16 = int_to_ptr.vmem [resolvable:$true] %s46_s16 }
  0x1a   :  { %s672_s1 = scalar_lea.vmem %s22_s14, 256  ;;  %p677_p11 = scmp.lt.s32.totalorder %s22_s14, %s22_s14 }
  0x1b   :  { %p673_p10 = scmp.ne.s32.totalorder %s22_s14, %s672_s1  ;;  %p678_p12 = scmp.lt.s32.totalorder %s672_s1, %s672_s1 }
  0x1d   :  { %p679_p13 = por %p678_p12, %p677_p11 }
  0x1f   :  { %p680_p0 = pnand %p679_p13, %p673_p10 }
  0x21   :  { %683 = shalt.err (!%p680_p0)
}
  0x22   :  { %27 = dma.hbm_to_vmem [thread:$0]  %s845_s0, 256, %s22_s14, [#allocation3], %s754_s29, %s754_s29, %s755_s30  }
  0x23   :  { %s692_s3 = scalar_lea.vmem %s47_s16, 32  ;;  %p697_p2 = scmp.lt.s32.totalorder %s47_s16, %s47_s16 }
  0x24   :  { %p693_p1 = scmp.ne.s32.totalorder %s47_s16, %s692_s3  ;;  %p698_p3 = scmp.lt.s32.totalorder %s692_s3, %s692_s3 }
  0x26   :  { %p699_p4 = por %p698_p3, %p697_p2 }
  0x28   :  { %p700_p5 = pnand %p699_p4, %p693_p1 }
  0x2a   :  { %703 = shalt.err (!%p700_p5)
}
  0x2b   :  { %49 = dma.hbm_to_vmem [thread:$0]  %s847_s2, 32, %s47_s16, [#allocation6]  }
  0x2c   :  { %s758_s21 = smov [#allocation10]  }
  0x2d   :  { %s69_s22 = sshll.u32 %s758_s21, 4  ;;  %s70_s22 = int_to_ptr.vmem [resolvable:$true] %s69_s22 }
  0x2e   :  { %s712_s23 = scalar_lea.vmem %s70_s22, 1024  ;;  %p717_p7 = scmp.lt.s32.totalorder %s70_s22, %s70_s22 }
  0x2f   :  { %p713_p6 = scmp.ne.s32.totalorder %s70_s22, %s712_s23  ;;  %p718_p8 = scmp.lt.s32.totalorder %s712_s23, %s712_s23 }
  0x31   :  { %p719_p9 = por %p718_p8, %p717_p7 }
  0x33   :  { %p720_p10 = pnand %p719_p9, %p713_p6 }
  0x35   :  { %723 = shalt.err (!%p720_p10)
}
  0x36   :  { %s759_s0 = smov 64   ;;  %s760_s24 = smov 4  }
  0x37   :  { %75 = dma.hbm_to_vmem [thread:$0]  %s850_s5, 1024, %s70_s22, [#allocation9], %s759_s0, %s759_s0, %s760_s24  }
  0x38   :  { %744 = dma.done.wait [#allocation3], 256  }
  0x39   :  { %745 = vsyncadd [#allocation3], 4294967040 }
  0x3a   :  { %746 = dma.done.wait [#allocation6], 544  }
  0x3b   :  { %747 = vsyncadd [#allocation6], 4294966752 }
  0x3c   :  { %748 = dma.done.wait [#allocation9], 3072  }
  0x3d   :  { %749 = vsyncadd [#allocation9], 4294964224  ;;  %v761_v0 = vmov 0   ;;  %v570_v1 = vld [vmem:[#allocation5 + $0x14] ss:$8 sps:$4 sm:$0xff]   ;;  %vm133_vm0 = vcmask 261120   ;;  %v103_v24 = vlaneseq }
  0x3e   :  { %169 = vmatprep.mubr.bf16.mxu0 %v761_v0  ;;  %335 = vmatprep.mubr.bf16.mxu1 %v761_v0  ;;  %v572_v2 = vld [vmem:[#allocation5 + $0x10] ss:$8 sps:$4 sm:$0xff]   ;;  %v573_v3 = vld [vmem:[#allocation5 + $0x4] ss:$8 sps:$4 sm:$0xff]   ;;  %v575_v4 = vld [vmem:[#allocation5] ss:$8 sps:$4 sm:$0xff]  }
  0x3f   :  { %149 = vmatprep.subr.bf16.mxu0 %v570_v1  ;;  %v94_v5 = vld [vmem:[#allocation2] sm:$0xff]  ;;  %v95_v6 = vld [vmem:[#allocation2 + $0x8] sm:$0xff]  ;;  %v581_v11 = vld [vmem:[#allocation8 + $0x60] ss:$8 sps:$4 sm:$0xff]   ;;  %v829_v25 = vshrl.u32 %v103_v24, 7  ;;  %v762_v51 = vmov 0.0  }
  0x40   :  { %150 = vmatpush1.bf16.msra.mxu0 %v572_v2  ;;  %v96_v7 = vpack.c.bf16 %v95_v6, %v94_v5  ;;  %v576_v8 = vld [vmem:[#allocation8 + $0x74] ss:$8 sps:$4 sm:$0xff]   ;;  %v578_v9 = vld [vmem:[#allocation8 + $0x70] ss:$8 sps:$4 sm:$0xff]   ;;  %v579_v10 = vld [vmem:[#allocation8 + $0x64] ss:$8 sps:$4 sm:$0xff]  }
  0x41   :  { %151 = vmatprep.subr.bf16.mxu0 %v573_v3  ;;  %303 = vmatprep.subr.bf16.mxu1 %v576_v8  ;;  %v582_v12 = vld [vmem:[#allocation8 + $0x54] ss:$8 sps:$4 sm:$0xff]   ;;  %v584_v13 = vld [vmem:[#allocation8 + $0x50] ss:$8 sps:$4 sm:$0xff]   ;;  %v585_v14 = vld [vmem:[#allocation8 + $0x44] ss:$8 sps:$4 sm:$0xff]  }
  0x42   :  { %304 = vmatpush1.bf16.msra.mxu1 %v578_v9  ;;  %v587_v15 = vld [vmem:[#allocation8 + $0x40] ss:$8 sps:$4 sm:$0xff]   ;;  %v588_v16 = vld [vmem:[#allocation8 + $0x34] ss:$8 sps:$4 sm:$0xff]   ;;  %v590_v17 = vld [vmem:[#allocation8 + $0x30] ss:$8 sps:$4 sm:$0xff]  }
  0x43   :  { %305 = vmatprep.subr.bf16.mxu1 %v579_v10  ;;  %v591_v18 = vld [vmem:[#allocation8 + $0x24] ss:$8 sps:$4 sm:$0xff]   ;;  %v593_v19 = vld [vmem:[#allocation8 + $0x20] ss:$8 sps:$4 sm:$0xff]   ;;  %v594_v20 = vld [vmem:[#allocation8 + $0x14] ss:$8 sps:$4 sm:$0xff]  }
  0x44   :  { %152 = vmatpush1.bf16.msra.mxu0 %v575_v4  ;;  %v596_v21 = vld [vmem:[#allocation8 + $0x10] ss:$8 sps:$4 sm:$0xff]   ;;  %v597_v22 = vld [vmem:[#allocation8 + $0x4] ss:$8 sps:$4 sm:$0xff]   ;;  %v599_v23 = vld [vmem:[#allocation8] ss:$8 sps:$4 sm:$0xff]  }
  0x45   :  { %v109_v26 = vsub.s32 1, %v829_v25  ;;  %v101_v27 = vld [vmem:[#allocation7] sm:$0x3]  ;;  %v105_v41 = vsub.s32 0, %v829_v25  ;;  %537 = vmatprep.subr.bf16.mxu0 %v762_v51  ;;  %v601_v52 = vld [vmem:[#allocation10 + $0x30] sm:$0xff]   ;;  %v602_v53 = vld [vmem:[#allocation10 + $0x28] sm:$0xff]  }
  0x46   :  { %306 = vmatpush1.bf16.msra.mxu1 %v581_v11  ;;  %v600_v50 = vld [vmem:[#allocation10 + $0x38] sm:$0xff]   ;;  %v603_v54 = vld [vmem:[#allocation10 + $0x20] sm:$0xff]   ;;  %vm763_vm1 = vmmov 0   ;;  %v605_v56 = vld [vmem:[#allocation10 + $0x10] sm:$0xff]   ;;  %s764_s28 = smov [#allocation11]  }
  0x47   :  { %498 = vmatmul.mubr.msk.bf16.vlgmr.msra.gmra.mxu0 %vm133_vm0, %v96_v7  ;;  %307 = vmatprep.subr.bf16.mxu1 %v582_v12  ;;  %v110_v28 = vrot.slane %v101_v27, %v109_v26  ;;  %v106_v42 = vrot.slane %v101_v27, %v105_v41  ;;  %v604_v55 = vld [vmem:[#allocation10 + $0x18] sm:$0xff]   ;;  %v606_v57 = vld [vmem:[#allocation10 + $0x8] sm:$0xff]   ;;  %v607_v58 = vld [vmem:[#allocation10] sm:$0xff]   ;;  %s480_s8 = sshll.u32 %s764_s28, 4  ;;  %s481_s8 = int_to_ptr.vmem [resolvable:$true] %s480_s8 }
  0x48   :  { %538 = vmatpush3.bf16.msra.mxu0 %v600_v50  ;;  %553 = vmatprep.mubr.msk.bf16.mxu0 %vm763_vm1, %v762_v51  ;;  %v211_v59 = vld [vmem:[%s849_s4] sm:$0x3]  ;;  %s724_s9 = scalar_lea.vmem %s481_s8, 256  ;;  %p729_p12 = scmp.lt.s32.totalorder %s481_s8, %s481_s8 }
  0x49   :  { %539 = vmatprep.subr.bf16.mxu0 %v762_v51  ;;  %v220_v60 = vrot.slane %v211_v59, %v109_v26  ;;  %v216_v9 = vrot.slane %v211_v59, %v105_v41  ;;  %p725_p11 = scmp.ne.s32.totalorder %s481_s8, %s724_s9  ;;  %p730_p13 = scmp.lt.s32.totalorder %s724_s9, %s724_s9 }
  0x4a   :  { %308 = vmatpush1.bf16.msra.mxu1 %v584_v13 }
  0x4b   :  { %309 = vmatprep.subr.bf16.mxu1 %v585_v14  ;;  %p731_p0 = por %p730_p13, %p729_p12 }
  0x4c   :  { %540 = vmatpush3.bf16.msra.mxu0 %v601_v52 }
  0x4d   :  { %541 = vmatprep.subr.bf16.mxu0 %v762_v51  ;;  %p732_p1 = pnand %p731_p0, %p725_p11 }
  0x4e   :  { %310 = vmatpush1.bf16.msra.mxu1 %v587_v15 }
  0x4f   :  { %311 = vmatprep.subr.bf16.mxu1 %v588_v16 }
  0x50   :  { %542 = vmatpush3.bf16.msra.mxu0 %v602_v53 }
  0x51   :  { %543 = vmatprep.subr.bf16.mxu0 %v762_v51 }
  0x52   :  { %312 = vmatpush1.bf16.msra.mxu1 %v590_v17  ;;  %v519_v17 = vld [vmem:[%s851_s6] ss:$0 sm:$0xff] }
  0x53   :  { %313 = vmatprep.subr.bf16.mxu1 %v591_v18 }
  0x54   :  { %544 = vmatpush3.bf16.msra.mxu0 %v603_v54 }
  0x55   :  { %545 = vmatprep.subr.bf16.mxu0 %v762_v51 }
  0x56   :  { %314 = vmatpush1.bf16.msra.mxu1 %v593_v19 }
  0x57   :  { %315 = vmatprep.subr.bf16.mxu1 %v594_v20 }
  0x58   :  { %546 = vmatpush3.bf16.msra.mxu0 %v604_v55 }
  0x59   :  { %547 = vmatprep.subr.bf16.mxu0 %v762_v51 }
  0x5a   :  { %316 = vmatpush1.bf16.msra.mxu1 %v596_v21 }
  0x5b   :  { %317 = vmatprep.subr.bf16.mxu1 %v597_v22 }
  0x5c   :  { %548 = vmatpush3.bf16.msra.mxu0 %v605_v56 }
  0x5d   :  { %549 = vmatprep.subr.bf16.mxu0 %v762_v51 }
  0x5e   :  { %318 = vmatpush1.bf16.msra.mxu1 %v599_v23 }
  0x60   :  { %550 = vmatpush3.bf16.msra.mxu0 %v606_v57 }
  0x61   :  { %551 = vmatprep.subr.bf16.mxu0 %v762_v51 }
  0x64   :  { %552 = vmatpush3.bf16.msra.mxu0 %v607_v58 }
 0x107   :  { %v171_v29 = vpop.f32.mrf.mxu0 }
 0x108   :  { %v172_v44 = vadd.f32 %v171_v29, %v106_v42 }
 0x109   :  { %v173_v30 = vpop.f32.mrf.mxu0 }
 0x10a   :  { %v174_v31 = vadd.f32 %v173_v30, %v110_v28 }
 0x10b   :  { %v175_v32 = vpop.f32.mrf.mxu0 }
 0x10c   :  { %v499_v33 = vmul.f32 -1.442695, %v174_v31  ;;  %v176_v45 = vadd.f32 %v175_v32, %v106_v42 }
 0x10d   :  { %v177_v34 = vpop.f32.mrf.mxu0 }
 0x10e   :  { %608 = vpow2.f32 %v499_v33  ;;  %v178_v35 = vadd.f32 %v177_v34, %v110_v28 }
 0x110   :  { %v500_v36 = vmul.f32 -1.442695, %v178_v35 }
 0x112   :  { %610 = vpow2.f32 %v500_v36 }
 0x11b   :  { %v609_v37 = vpop.eup %608 }
 0x11c   :  { %v186_v38 = vadd.f32 1.0, %v609_v37 }
 0x11e   :  { %612 = vrcp.f32 %v186_v38 }
 0x11f   :  { %v611_v39 = vpop.eup %610 }
 0x120   :  { %v187_v40 = vadd.f32 1.0, %v611_v39 }
 0x122   :  { %614 = vrcp.f32 %v187_v40 }
 0x12b   :  { %v613_v43 = vpop.eup %612 }
 0x12c   :  { %v192_v47 = vmul.f32 %v613_v43, %v172_v44 }
 0x12f   :  { %v615_v46 = vpop.eup %614 }
 0x130   :  { %v193_v48 = vmul.f32 %v615_v46, %v176_v45 }
 0x132   :  { %v194_v49 = vpack.c.bf16 %v193_v48, %v192_v47 }
 0x134   :  { %336 = vmatmul.mubr.bf16.vlgmr.msra.gmra.mxu1 %v194_v49 }
 0x1f4   :  { %v337_v61 = vpop.f32.mrf.mxu1 }
 0x1f5   :  { %v338_v11 = vadd.f32 %v337_v61, %v216_v9 }
 0x1f6   :  { %v339_v62 = vpop.f32.mrf.mxu1 }
 0x1f7   :  { %v340_v63 = vadd.f32 %v339_v62, %v220_v60 }
 0x1f8   :  { %v341_v0 = vpop.f32.mrf.mxu1 }
 0x1f9   :  { %v517_v1 = vmul.f32 -1.442695, %v340_v63  ;;  %v342_v12 = vadd.f32 %v341_v0, %v216_v9 }
 0x1fa   :  { %v343_v2 = vpop.f32.mrf.mxu1 }
 0x1fb   :  { %616 = vpow2.f32 %v517_v1  ;;  %v344_v3 = vadd.f32 %v343_v2, %v220_v60 }
 0x1fd   :  { %v518_v4 = vmul.f32 -1.442695, %v344_v3 }
 0x1ff   :  { %618 = vpow2.f32 %v518_v4 }
 0x208   :  { %v617_v5 = vpop.eup %616 }
 0x209   :  { %v352_v6 = vadd.f32 1.0, %v617_v5 }
 0x20b   :  { %620 = vrcp.f32 %v352_v6 }
 0x20c   :  { %v619_v7 = vpop.eup %618 }
 0x20d   :  { %v353_v8 = vadd.f32 1.0, %v619_v7 }
 0x20f   :  { %622 = vrcp.f32 %v353_v8 }
 0x218   :  { %v621_v10 = vpop.eup %620 }
 0x219   :  { %v358_v14 = vmul.f32 %v621_v10, %v338_v11 }
 0x21c   :  { %v623_v13 = vpop.eup %622 }
 0x21d   :  { %v359_v15 = vmul.f32 %v623_v13, %v342_v12 }
 0x21f   :  { %v360_v16 = vpack.c.bf16 %v359_v15, %v358_v14 }
 0x221   :  { %554 = vmatmul.mubr.bf16.vlgmr.msra.gmra.mxu0 %v360_v16 }
 0x2e1   :  { %v466_v18 = vpop.f32.mrf.mxu0 }
 0x2e2   :  { %v467_v19 = vadd.f32 %v519_v17, %v466_v18 }
 0x2e3   :  { %v555_v20 = vpop.f32.mrf.mxu0 }
 0x2e4   :  { %473 = vst [vmem:[#allocation11] sm:$0xff] %v467_v19 }
 0x2e5   :  { %v469_v21 = vpop.f32.mrf.mxu0 }
 0x2e6   :  { %v470_v22 = vadd.f32 %v519_v17, %v469_v21 }
 0x2e7   :  { %v556_v23 = vpop.f32.mrf.mxu0 }
 0x2e8   :  { %474 = vst [vmem:[#allocation11 + $0x8] sm:$0xff] %v470_v22 }
 0x2e9   :  { %735 = shalt.err (!%p732_p1)
}
 0x2ea   :  { %486 = dma.vmem_to_hbm [thread:$0]  %s481_s8, 256, %s852_s7, [#allocation4], %s754_s29, %s754_s29, %s755_s30  }
 0x2eb   :  { %750 = dma.done.wait [#allocation4], 256  }
 0x2ec   :  { %751 = vsyncadd [#allocation4], 4294967040 }
 0x2ed   :  { %490 = vsyncpa [#allocation3], 1 }
 0x2ee   :  { %491 = vsyncpa [#allocation6], 1 }
 0x2ef   :  { %492 = vsyncpa [#allocation9], 1 }
 0x2f0   :  { %493 = vsyncpa [#allocation4], 1 }

</bundles_post_ra>
